<compile_context>
chip_gen: v7x
topology: tpu7x:2x2x1
jax: 0.10.0
libtpu: 0.0.40
codegen_flags: <defaults>
</compile_context>

<pallas_src>
import functools

import jax
import jax.numpy as jnp
from jax.experimental import pallas as pl
from jax.experimental.pallas import tpu as pltpu

EPS = 1e-5  # PyTorch InstanceNorm default


# ---------------------------------------------------------------------------
# Fused kernel: conv1x1 + IN + ReLU + conv1x1x1 + IN + ReLU + depth-broadcast
# grid = (B, D // d_tile); both axes are independent ("parallel").
# ---------------------------------------------------------------------------
def _fused_kernel(x_ref, w1_ref, b1_ref, w2_ref, b2_ref, o_ref, *, d_tile):
    # x_ref  : (1, Cin, S)   channels on sublanes, S on lanes
    # w1_ref : (Cout, Cin)   b1_ref : (Cout, 1)
    # w2_ref : (Cout, Cout)  b2_ref : (Cout, 1)
    # o_ref  : (1, Cout, d_tile, S)
    x = x_ref[0]                                                   # (Cin, S)
    inv_s = 1.0 / x.shape[1]

    # --- Conv2d 1x1 + bias --------------------------------------------------
    y = jnp.dot(w1_ref[...], x, preferred_element_type=jnp.float32)
    y = y + b1_ref[...]                                            # (Cout, S)

    # --- InstanceNorm2d (two-pass, centered variance) + ReLU -----------------
    m1 = jnp.sum(y, axis=1, keepdims=True) * inv_s
    yc = y - m1
    v1 = jnp.sum(yc * yc, axis=1, keepdims=True) * inv_s
    yn = jnp.maximum(yc * jax.lax.rsqrt(v1 + EPS), 0.0)

    # --- Conv3d 1x1x1 + bias (depth-invariant => computed on one slice) -----
    z = jnp.dot(w2_ref[...], yn, preferred_element_type=jnp.float32)
    z = z + b2_ref[...]                                            # (Cout, S)

    # --- InstanceNorm3d over D*H*W == InstanceNorm over H*W (depth-constant) -
    m2 = jnp.sum(z, axis=1, keepdims=True) * inv_s
    zc = z - m2
    v2 = jnp.sum(zc * zc, axis=1, keepdims=True) * inv_s
    slab = jnp.maximum(zc * jax.lax.rsqrt(v2 + EPS), 0.0).astype(o_ref.dtype)

    # Store this depth tile: broadcast the (Cout, S) slice over d_tile sublanes.
    o_ref[0] = jnp.broadcast_to(slab[:, None, :],
                                (slab.shape[0], d_tile, slab.shape[1]))
    # TODO(synk): for even lower VMEM / vst pressure, replicate on the DMA side
    # (out memory_space=pl.ANY + per-depth pltpu.make_async_copy from the slab).


# ---------------------------------------------------------------------------
# Generation-aware VMEM budgeting and depth-tile selection.
# ---------------------------------------------------------------------------
def _vmem_budget():
    """(physical VMEM capacity, usable limit) with ~25% compiler headroom."""
    cap = 64 << 20  # conservative default = v7x per-TC VMEM
    try:
        info = pltpu.get_tpu_info()
        cap = int(getattr(info, "vmem_capacity_bytes", cap)) or cap
    except Exception:
        pass
    limit = min((cap * 3) // 4, 100 << 20)   # ~48 MiB v7x, ~96 MiB v5e/v6e
    return cap, limit


def _fixed_vmem_bytes(Cin, Cout, S):
    """Double-buffered input block + (small) resident weight/bias blocks."""
    return (2 * Cin * S + Cout * Cin + Cout * Cout + 2 * Cout) * 4


def _pick_d_tile(D, Cin, Cout, S, vmem_limit, out_itemsize):
    """Largest legal depth tile (multiple of 8 dividing D, or full D) whose
    double-buffered output block fits the VMEM budget.  Never silently
    ignores the budget; falls back to the smallest legal tile."""
    budget = vmem_limit - _fixed_vmem_bytes(Cin, Cout, S) - (4 << 20)
    cands = sorted({D, *[dt for dt in range(8, D, 8) if D % dt == 0]},
                   reverse=True)
    for dt in cands:
        if 2 * Cout * dt * S * out_itemsize <= budget:
            return dt
    return min(cands)  # smallest legal tile; caller sizes vmem_limit to cover it


# ---------------------------------------------------------------------------
# pallas_call wrapper
# ---------------------------------------------------------------------------
def _fused_call(x2d, w1, b1, w2, b2, depth, d_tile, out_dtype, vmem_limit):
    B, Cin, S = x2d.shape
    Cout = w1.shape[0]
    n_d = depth // d_tile
    out_bpe = jnp.dtype(out_dtype).itemsize
    kernel = functools.partial(_fused_kernel, d_tile=d_tile)

    cost = pl.CostEstimate(
        flops=2 * B * S * (Cout * Cin + Cout * Cout),
        transcendentals=0,
        bytes_accessed=(B * Cin * S * 4
                        + B * Cout * depth * S * out_bpe
                        + (Cout * Cin + Cout * Cout + 2 * Cout) * 4),
    )

    return pl.pallas_call(
        kernel,
        out_shape=jax.ShapeDtypeStruct((B, Cout, depth, S), out_dtype),
        grid_spec=pltpu.PrefetchScalarGridSpec(
            num_scalar_prefetch=0,
            grid=(B, n_d),
            in_specs=[
                pl.BlockSpec((1, Cin, S), lambda b, d: (b, 0, 0)),
                pl.BlockSpec((Cout, Cin), lambda b, d: (0, 0)),
                pl.BlockSpec((Cout, 1), lambda b, d: (0, 0)),
                pl.BlockSpec((Cout, Cout), lambda b, d: (0, 0)),
                pl.BlockSpec((Cout, 1), lambda b, d: (0, 0)),
            ],
            out_specs=pl.BlockSpec((1, Cout, d_tile, S),
                                   lambda b, d: (b, 0, d, 0)),
        ),
        compiler_params=pltpu.CompilerParams(
            # No cross-iteration state: slab recomputed per step, so both axes
            # are safely "parallel" (megacore shards depth when B is small).
            dimension_semantics=("parallel", "parallel"),
            vmem_limit_bytes=vmem_limit,
        ),
        cost_estimate=cost,
    )(x2d, w1, b1, w2, b2)


# ---------------------------------------------------------------------------
# Module wrapper: only free reshapes outside the kernel (no transposes).
# ---------------------------------------------------------------------------
def linker_dimension_up_conv(x_nchw, params, decoder_input_shape,
                             d_tile=None, out_dtype=jnp.float32):
    """x_nchw: [B, Cin, H, W] -> [B, Cout, D, H, W], D = decoder_input_shape.

    out_dtype=jnp.bfloat16 halves output HBM traffic if the decoder accepts it
    (default float32 matches the PyTorch module exactly)."""
    B, Cin, H, W = x_nchw.shape
    Cout = params["w1"].shape[0]
    D = int(decoder_input_shape)
    S = H * W
    out_bpe = jnp.dtype(out_dtype).itemsize

    cap, limit = _vmem_budget()
    if d_tile is None:
        d_tile = _pick_d_tile(D, Cin, Cout, S, limit, out_bpe)
    assert D % d_tile == 0 and (d_tile % 8 == 0 or d_tile == D), (D, d_tile)

    # Make sure the compiler gets enough scoped VMEM for the chosen blocks,
    # but never exceed physical capacity (minus headroom).
    needed = _fixed_vmem_bytes(Cin, Cout, S) + 2 * Cout * d_tile * S * out_bpe
    vmem_limit = int(min(cap - (2 << 20), max(limit, needed + (2 << 20))))

    x2d = x_nchw.reshape(B, Cin, S)                      # free (no transpose)
    b1 = params["b1"].reshape(Cout, 1)
    b2 = params["b2"].reshape(Cout, 1)
    vol = _fused_call(x2d, params["w1"], b1, params["w2"], b2,
                      D, d_tile, out_dtype, vmem_limit)
    return vol.reshape(B, Cout, D, H, W)                 # free -> NCDHW
    # TODO(synk): for H*W not a multiple of 128 the output stores are masked
    # (correct, slower); for very large H*W add an S-tile grid axis with
    # cross-tile InstanceNorm statistics instead of full-S blocks.


# ---------------------------------------------------------------------------
# Pure-JAX reference (direct transcription of the PyTorch forward)
# ---------------------------------------------------------------------------
def _reference(x, params, depth):
    w1, b1, w2, b2 = params["w1"], params["b1"], params["w2"], params["b2"]
    B, Cin, H, W = x.shape
    Cout = w1.shape[0]
    y = jnp.einsum("bchw,oc->bohw", x, w1) + b1.reshape(1, -1, 1, 1)
    m = y.mean(axis=(2, 3), keepdims=True)
    v = ((y - m) ** 2).mean(axis=(2, 3), keepdims=True)
    y = jnp.maximum((y - m) * jax.lax.rsqrt(v + EPS), 0.0)
    z = jnp.broadcast_to(y[:, :, None, :, :], (B, Cout, depth, H, W))
    z2 = jnp.einsum("bcdhw,oc->bodhw", z, w2) + b2.reshape(1, -1, 1, 1, 1)
    m = z2.mean(axis=(2, 3, 4), keepdims=True)
    v = ((z2 - m) ** 2).mean(axis=(2, 3, 4), keepdims=True)
    return jnp.maximum((z2 - m) * jax.lax.rsqrt(v + EPS), 0.0)


if __name__ == "__main__":
    # Small synthetic config: encoder_out_channel=4, encoder_out_shape=16,
    # decoder_input_shape=16, decoder_input_nc=16, norm_layer=InstanceNorm.
    B, Cin, H, W = 2, 4, 16, 16
    Cout = 16
    D = 16  # decoder_input_shape (depth of the dimension-up volume)

    key = jax.random.PRNGKey(0)
    kx, kw1, kb1, kw2, kb2 = jax.random.split(key, 5)

    x = jax.random.normal(kx, (B, Cin, H, W), dtype=jnp.float32)
    params = {
        # Conv2d weight [Cout, Cin, 1, 1] stored as [Cout, Cin].
        "w1": jax.random.normal(kw1, (Cout, Cin), dtype=jnp.float32) * 0.1,
        "b1": jax.random.normal(kb1, (Cout,), dtype=jnp.float32) * 0.1,
        # Conv3d weight [Cout, Cout, 1, 1, 1] stored as [Cout, Cout].
        "w2": jax.random.normal(kw2, (Cout, Cout), dtype=jnp.float32) * 0.1,
        "b2": jax.random.normal(kb2, (Cout,), dtype=jnp.float32) * 0.1,
    }

    # d_tile is auto-picked (full depth fits VMEM here -> grid = (B, 1)).
    out = linker_dimension_up_conv(x, params, D)
    out = jax.block_until_ready(out)
    assert out.shape == (B, Cout, D, H, W), out.shape

    ref = _reference(x, params, D)
    assert jnp.allclose(out, ref, atol=1e-3, rtol=1e-3), float(
        jnp.max(jnp.abs(out - ref))
    )

    print("KERNEL_OK")
</pallas_src>

<mosaic_0001>
module attributes {stable_mosaic.version = 11 : i64} {
  func.func @_fused_kernel(%arg0: i32, %arg1: i32, %arg2: memref<1x4x256xf32, #tpu.memory_space<vmem>>, %arg3: memref<16x4xf32, #tpu.memory_space<vmem>>, %arg4: memref<16x1xf32, #tpu.memory_space<vmem>>, %arg5: memref<16x16xf32, #tpu.memory_space<vmem>>, %arg6: memref<16x1xf32, #tpu.memory_space<vmem>>, %arg7: memref<1x16x16x256xf32, #tpu.memory_space<vmem>>) attributes {dimension_semantics = [#tpu.dimension_semantics<parallel>, #tpu.dimension_semantics<parallel>], iteration_bounds = array<i64: 2, 1>, scalar_prefetch = 0 : i64, scratch_operands = 0 : i64, tpu.core_type = #tpu.core_type<tc>, window_params = [{transform_indices = @transform_0, window_bounds = array<i64: 1, 4, 256>}, {pipeline_mode = #tpu.pipeline_mode<synchronous>, transform_indices = @transform_1, window_bounds = array<i64: 16, 4>}, {pipeline_mode = #tpu.pipeline_mode<synchronous>, transform_indices = @transform_2, window_bounds = array<i64: 16, 1>}, {pipeline_mode = #tpu.pipeline_mode<synchronous>, transform_indices = @transform_3, window_bounds = array<i64: 16, 16>}, {pipeline_mode = #tpu.pipeline_mode<synchronous>, transform_indices = @transform_4, window_bounds = array<i64: 16, 1>}, {transform_indices = @transform_5, window_bounds = array<i64: 1, 16, 16, 256>}]} {
    %c0 = arith.constant 0 : index
    %c0_0 = arith.constant 0 : index
    %c0_1 = arith.constant 0 : index
    %0 = vector.load %arg2[%c0, %c0_0, %c0_1] : memref<1x4x256xf32, #tpu.memory_space<vmem>>, vector<1x4x256xf32>
    %1 = vector.shape_cast %0 : vector<1x4x256xf32> to vector<4x256xf32>
    %c0_2 = arith.constant 0 : index
    %c0_3 = arith.constant 0 : index
    %2 = vector.load %arg3[%c0_2, %c0_3] : memref<16x4xf32, #tpu.memory_space<vmem>>, vector<16x4xf32>
    %cst = arith.constant dense<0.000000e+00> : vector<16x256xf32>
    %3 = tpu.matmul %2, %1, %cst {dimension_numbers = #tpu.dot_dimension_numbers<[1], [0], [0], [1], [0, 0, 1, 1], [], []>} : vector<16x4xf32>, vector<4x256xf32>, vector<16x256xf32> -> vector<16x256xf32>
    %c0_4 = arith.constant 0 : index
    %c0_5 = arith.constant 0 : index
    %4 = vector.load %arg4[%c0_4, %c0_5] : memref<16x1xf32, #tpu.memory_space<vmem>>, vector<16x1xf32>
    %5 = vector.broadcast %4 : vector<16x1xf32> to vector<16x256xf32>
    %6 = arith.addf %3, %5 : vector<16x256xf32>
    %cst_6 = arith.constant dense<0.000000e+00> : vector<16xf32>
    %7 = vector.multi_reduction <add>, %6, %cst_6 [1] : vector<16x256xf32> to vector<16xf32>
    %8 = vector.shape_cast %7 : vector<16xf32> to vector<16x1xf32>
    %cst_7 = arith.constant 3.906250e-03 : f32
    %9 = vector.broadcast %cst_7 : f32 to vector<16x1xf32>
    %10 = arith.mulf %8, %9 : vector<16x1xf32>
    %11 = vector.broadcast %10 : vector<16x1xf32> to vector<16x256xf32>
    %12 = arith.subf %6, %11 : vector<16x256xf32>
    %13 = arith.mulf %12, %12 : vector<16x256xf32>
    %cst_8 = arith.constant dense<0.000000e+00> : vector<16xf32>
    %14 = vector.multi_reduction <add>, %13, %cst_8 [1] : vector<16x256xf32> to vector<16xf32>
    %15 = vector.shape_cast %14 : vector<16xf32> to vector<16x1xf32>
    %cst_9 = arith.constant 3.906250e-03 : f32
    %16 = vector.broadcast %cst_9 : f32 to vector<16x1xf32>
    %17 = arith.mulf %15, %16 : vector<16x1xf32>
    %cst_10 = arith.constant 9.99999974E-6 : f32
    %18 = vector.broadcast %cst_10 : f32 to vector<16x1xf32>
    %19 = arith.addf %17, %18 : vector<16x1xf32>
    %20 = math.rsqrt %19 : vector<16x1xf32>
    %21 = vector.broadcast %20 : vector<16x1xf32> to vector<16x256xf32>
    %22 = arith.mulf %12, %21 : vector<16x256xf32>
    %cst_11 = arith.constant 0.000000e+00 : f32
    %23 = vector.broadcast %cst_11 : f32 to vector<16x256xf32>
    %24 = arith.maximumf %22, %23 : vector<16x256xf32>
    %c0_12 = arith.constant 0 : index
    %c0_13 = arith.constant 0 : index
    %25 = vector.load %arg5[%c0_12, %c0_13] : memref<16x16xf32, #tpu.memory_space<vmem>>, vector<16x16xf32>
    %cst_14 = arith.constant dense<0.000000e+00> : vector<16x256xf32>
    %26 = tpu.matmul %25, %24, %cst_14 {dimension_numbers = #tpu.dot_dimension_numbers<[1], [0], [0], [1], [0, 0, 1, 1], [], []>} : vector<16x16xf32>, vector<16x256xf32>, vector<16x256xf32> -> vector<16x256xf32>
    %c0_15 = arith.constant 0 : index
    %c0_16 = arith.constant 0 : index
    %27 = vector.load %arg6[%c0_15, %c0_16] : memref<16x1xf32, #tpu.memory_space<vmem>>, vector<16x1xf32>
    %28 = vector.broadcast %27 : vector<16x1xf32> to vector<16x256xf32>
    %29 = arith.addf %26, %28 : vector<16x256xf32>
    %cst_17 = arith.constant dense<0.000000e+00> : vector<16xf32>
    %30 = vector.multi_reduction <add>, %29, %cst_17 [1] : vector<16x256xf32> to vector<16xf32>
    %31 = vector.shape_cast %30 : vector<16xf32> to vector<16x1xf32>
    %cst_18 = arith.constant 3.906250e-03 : f32
    %32 = vector.broadcast %cst_18 : f32 to vector<16x1xf32>
    %33 = arith.mulf %31, %32 : vector<16x1xf32>
    %34 = vector.broadcast %33 : vector<16x1xf32> to vector<16x256xf32>
    %35 = arith.subf %29, %34 : vector<16x256xf32>
    %36 = arith.mulf %35, %35 : vector<16x256xf32>
    %cst_19 = arith.constant dense<0.000000e+00> : vector<16xf32>
    %37 = vector.multi_reduction <add>, %36, %cst_19 [1] : vector<16x256xf32> to vector<16xf32>
    %38 = vector.shape_cast %37 : vector<16xf32> to vector<16x1xf32>
    %cst_20 = arith.constant 3.906250e-03 : f32
    %39 = vector.broadcast %cst_20 : f32 to vector<16x1xf32>
    %40 = arith.mulf %38, %39 : vector<16x1xf32>
    %cst_21 = arith.constant 9.99999974E-6 : f32
    %41 = vector.broadcast %cst_21 : f32 to vector<16x1xf32>
    %42 = arith.addf %40, %41 : vector<16x1xf32>
    %43 = math.rsqrt %42 : vector<16x1xf32>
    %44 = vector.broadcast %43 : vector<16x1xf32> to vector<16x256xf32>
    %45 = arith.mulf %35, %44 : vector<16x256xf32>
    %cst_22 = arith.constant 0.000000e+00 : f32
    %46 = vector.broadcast %cst_22 : f32 to vector<16x256xf32>
    %47 = arith.maximumf %45, %46 : vector<16x256xf32>
    %48 = vector.shape_cast %47 : vector<16x256xf32> to vector<16x1x256xf32>
    %49 = vector.shape_cast %48 : vector<16x1x256xf32> to vector<16x1x256xf32>
    %50 = vector.broadcast %49 : vector<16x1x256xf32> to vector<16x16x256xf32>
    %c0_23 = arith.constant 0 : index
    %c0_24 = arith.constant 0 : index
    %c0_25 = arith.constant 0 : index
    %c0_26 = arith.constant 0 : index
    %51 = vector.load %arg7[%c0_23, %c0_24, %c0_25, %c0_26] : memref<1x16x16x256xf32, #tpu.memory_space<vmem>>, vector<1x16x16x256xf32>
    %52 = vector.shape_cast %51 : vector<1x16x16x256xf32> to vector<16x16x256xf32>
    %53 = vector.shape_cast %50 : vector<16x16x256xf32> to vector<1x16x16x256xf32>
    tpu.vector_store %arg7[%c0_23, %c0_24, %c0_25, %c0_26], %53 {strides = array<i32>} : memref<1x16x16x256xf32, #tpu.memory_space<vmem>>, vector<1x16x16x256xf32>,
    return
  }
  func.func @transform_0(%arg0: i32, %arg1: i32) -> (i32, i32, i32) {
    %c0_i32 = arith.constant 0 : i32
    %c0_i32_0 = arith.constant 0 : i32
    %c0_i32_1 = arith.constant 0 : i32
    return %arg0, %c0_i32, %c0_i32_0 : i32, i32, i32
  }
  func.func @transform_1(%arg0: i32, %arg1: i32) -> (i32, i32) {
    %c0_i32 = arith.constant 0 : i32
    %c0_i32_0 = arith.constant 0 : i32
    %c0_i32_1 = arith.constant 0 : i32
    return %c0_i32, %c0_i32_0 : i32, i32
  }
  func.func @transform_2(%arg0: i32, %arg1: i32) -> (i32, i32) {
    %c0_i32 = arith.constant 0 : i32
    %c0_i32_0 = arith.constant 0 : i32
    %c0_i32_1 = arith.constant 0 : i32
    return %c0_i32, %c0_i32_0 : i32, i32
  }
  func.func @transform_3(%arg0: i32, %arg1: i32) -> (i32, i32) {
    %c0_i32 = arith.constant 0 : i32
    %c0_i32_0 = arith.constant 0 : i32
    %c0_i32_1 = arith.constant 0 : i32
    return %c0_i32, %c0_i32_0 : i32, i32
  }
  func.func @transform_4(%arg0: i32, %arg1: i32) -> (i32, i32) {
    %c0_i32 = arith.constant 0 : i32
    %c0_i32_0 = arith.constant 0 : i32
    %c0_i32_1 = arith.constant 0 : i32
    return %c0_i32, %c0_i32_0 : i32, i32
  }
  func.func @transform_5(%arg0: i32, %arg1: i32) -> (i32, i32, i32, i32) {
    %c0_i32 = arith.constant 0 : i32
    %c0_i32_0 = arith.constant 0 : i32
    %c0_i32_1 = arith.constant 0 : i32
    return %arg0, %c0_i32, %arg1, %c0_i32_0 : i32, i32, i32, i32
  }
}

</mosaic_0001>

<bundles_post_ra>
// kernel: tpu_custom_call.1
= control target key start
LH: loop header
LB: loop body
LE: loop exit
PB: predicated region body
PF: predicated region fallthrough
CT: control target
= control target key end

     0   :  { %10 = vsyncpa [#allocation3], 0  ;;  %s1408_s0 = inlined_call_operand.vmem [shape: f32[2,4,256], index: 0, kind: input, shape index: {}]   ;;  %s1409_s1 = inlined_call_operand.vmem [shape: f32[16,4], index: 1, kind: input, shape index: {}]   ;;  %s1410_s2 = inlined_call_operand.vmem [shape: f32[16,1], index: 2, kind: input, shape index: {}]   ;;  %s1411_s3 = inlined_call_operand.vmem [shape: f32[16,16], index: 3, kind: input, shape index: {}]   ;;  %s1412_s4 = inlined_call_operand.vmem [shape: f32[16,1], index: 4, kind: input, shape index: {}]   ;;  %s1413_s5 = inlined_call_operand.hbm [shape: f32[2,16,16,256], index: 5, kind: output, shape index: {}]  }
   0x1   :  { %12 = vsyncpa [#allocation3 + $0x1], 0  ;;  %s1144_s18 = smov 0   ;;  %s1146_s19 = smov 0  }
   0x2   :  { %s1148_s20 = smov 0   ;;  %s1150_s21 = smov 0  }
   0x3   :  { %s1152_s22 = smov 0   ;;  %s1154_s23 = smov 0  }
   0x4 LB: > { %s932_s24 = sadd.s32 4294967295, %s1106_s23   ;;  %s933_s25 = sadd.s32 4294967294, %s1106_s23   ;;  %s1106_s23 = sphi %s1154_s23, %s18_s23   ;;  %s1102_s22 = sphi %s1152_s22, %s1420_s22   ;;  %s1098_s21 = sphi %s1150_s21, %s1419_s21   ;;  %s1094_s20 = sphi %s1148_s20, %s1418_s20   ;;  %s1090_s19 = sphi %s1146_s19, %s1417_s19   ;;  %s1086_s18 = sphi %s1144_s18, %s1416_s18  }
   0x5   : > { %s30_s26 = sadd.s32 1, %s1102_s22  ;;  %s149_s27 = sadd.s32 1, %s1094_s20 }
   0x6   : > { %p32_p0 = scmp.ge.s32.totalorder %s30_s26, 2  ;;  %p159_p1 = scmp.ne.s32.totalorder %s1094_s20, %s1090_s19 }
   0x7   : > { %p160_p2 = scmp.eq.s32.totalorder %s932_s24, 1  ;;  %p165_p3 = scmp.ne.s32.totalorder %s1090_s19, %s1086_s18 }
   0x8   : > { %s1422_s26 = smov (%p32_p0, %s30_s26), 0  ;;  %p166_p5 = scmp.eq.s32.totalorder %s933_s25, 1 }
   0x9   : > { %p1184_p4 = por %p160_p2, %p159_p1  ;;  %s144_s29 = ssub.s32 %s1102_s22, %s1422_s26 }
   0xa   : > { %p936_p6 = scmp.ge.s32.totalorder %s1106_s23, 1  ;;  %p147_p7 = scmp.eq.s32.totalorder %s144_s29, 0 }
   0xb   : > { %p1191_p8 = por %p166_p5, %p165_p3  ;;  %p204_p9 = scmp.lt.s32.totalorder %s1106_s23, 3 }
   0xc   : > { %s1197_s6 = scalar_select %p147_p7, %s1094_s20, %s149_s27  }
   0xd   : > { %p205_p10 = pnand %p936_p6, %p204_p9 }
   0xe   : > { %p232_p11 = scmp.lt.s32.totalorder (!%p205_p10), %s1098_s21, 1  ;;  %v1108_v0 = vmov (!%p205_p10), 0.0   ;;  %v241_v1 = vld [vmem:[%s1410_s2] sm:$0xff] (!%p205_p10)  ;;  %v1109_v2 = vmov (!%p205_p10), 0   ;;  %v242_v3 = vld [vmem:[%s1410_s2 + $0x8] sm:$0xff] (!%p205_p10)  ;;  %vm262_vm0 = vcmask (!%p205_p10), 1043456  }
   0xf   : > { %208 = sbr.rel (%p205_p10) target bundleno = 1153 (0x481), region = 40  ;;  %331 = vmatprep.mubr.f32.mxu0 (!%p205_p10), %v1108_v0  ;;  %465 = vmatprep.mubr.f32.mxu1 (!%p205_p10), %v1108_v0  ;;  %v239_v6 = vld [vmem:[%s1409_s1] sm:$0xff] (!%p205_p10)  ;;  %vm255_vm1 = vcmask (!%p205_p10), 31744   ;;  %v240_v7 = vld [vmem:[%s1409_s1 + $0x8] sm:$0xff] (!%p205_p10)  ;;  %vm394_vm2 = vcmask (!%p205_p10), 130048   ;;  %s229_s13 = sand.u32 (!%p205_p10), 1, %s1090_s19  }
  0x10   : > { %1017 = vset.pattern.permute.xlu0 (!%p205_p10), %v1109_v2  ;;  %1018 = vset.pattern.permute.xlu1 (!%p205_p10), %v1109_v2  ;;  %v382_v34 = vld [vmem:[%s1412_s4] sm:$0xff] (!%p205_p10)  ;;  %v383_v35 = vld [vmem:[%s1412_s4 + $0x8] sm:$0xff] (!%p205_p10)  ;;  %s937_s14 = sshll.u32 (!%p205_p10), %s229_s13, 9  ;;  %s952_s16 = sshll.u32 (!%p205_p10), %s1098_s21, 13 }
  0x11   : > { %245 = vperm.xlu0 (!%p205_p10), %1017, %v241_v1   ;;  %v380_v54 = vld [vmem:[%s1411_s3] sm:$0xff] (!%p205_p10)  ;;  %v381_v55 = vld [vmem:[%s1411_s3 + $0x8] sm:$0xff] (!%p205_p10)  ;;  %s1334_s25 = scalar_lea.hbm (!%p205_p10), %s1413_s5, %s952_s16  ;;  %s1362_s27 = scalar_lea.sflag (!%p205_p10), [#allocation3], %s229_s13 }
  0x12   : > { %s1111_s7 = smov (!%p205_p10), [#allocation2]  }
  0x13   : > { %s1032_s8 = sshll.u32 (!%p205_p10), %s1111_s7, 4  ;;  %s1033_s8 = int_to_ptr.vmem [resolvable:$false] %s1032_s8 }
  0x15   : > { %250 = vperm.xlu0 (!%p205_p10), %1017, %v242_v3  }
  0x16   : > { %s233_s9 = scalar_select %p232_p11, %s1098_s21, 1 }
  0x18   : > { %s951_s10 = sshll.u32 %s233_s9, 3  ;;  %s1034_s9 = scalar_lea.vmem %s1033_s8, 16384 }
  0x19   : > { %s236_s15 = scalar_lea.vmem %s1408_s0, %s951_s10 }
  0x1a   : > { %v238_v4 = vld [vmem:[%s236_s15] sm:$0xff]  ;;  %s1257_s15 = scalar_lea.vmem [#allocation2], %s937_s14 }
  0x1b   : > { %v254_v5 = vcombine.high %v238_v4, %v238_v4  ;;  %s859_s17 = sshll.u32 %s1257_s15, 4  ;;  %s1336_s17 = int_to_ptr.vmem [resolvable:$true] %s859_s17 }
  0x1c   : > { %s1028_s29 = scalar_lea.vmem %s1336_s17, 8192  ;;  %p1035_p1 = scmp.lt.s32.totalorder %s1336_s17, %s1033_s8 }
  0x1d   : > { %940 = vmatprep.subr.msk.mxu0 %vm262_vm0, %v254_v5  ;;  %p1029_p12 = scmp.ne.s32.totalorder %s1336_s17, %s1028_s29  ;;  %p1036_p2 = scmp.lt.s32.totalorder %s1034_s9, %s1028_s29 }
  0x1e   : > { %941 = vmatpush1.msk.msra.mxu0 %vm262_vm0, %v238_v4 }
  0x1f   : > { %942 = vmatmul.mubr.msk.f32.vlgmr.msra.gmra.mrb[0].mxu0 %vm255_vm1, %v239_v6  ;;  %p1030_p13 = pnand %p1029_p12, %p1184_p4  ;;  %p1037_p3 = por %p1036_p2, %p1035_p1 }
  0x20   : > { %337 = vmatprep.mubr.f32.mxu0 %v1108_v0 }
  0x21   : > { %p1031_p0 = pneg %p1030_p13 }
  0x23   : > { %943 = vmatmul.mubr.msk.f32.gmra.mrb[2].mxu0 %vm255_vm1, %v240_v7  ;;  %p1038_p5 = pnand %p1037_p3, %p1031_p0 }
  0x90   : > { %v246_v8 = vpop.permute.xlu0 %245 }
  0x94   : > { %v251_v13 = vpop.permute.xlu0 %250 }
  0xf2   : > { %v333_v9 = vpop.f32.mrb[0].mxu0 }
  0xf3   : > { %v334_v10 = vadd.f32 %v333_v9, %v246_v8  ;;  %v335_v11 = vpop.f32.mrb[1].mxu0 }
  0xf4   : > { %v336_v12 = vadd.f32 %v335_v11, %v246_v8 }
  0xf6   : > { %v339_v14 = vpop.f32.mrb[2].mxu0  ;;  %v344_v15 = vadd.f32 %v336_v12, %v334_v10 }
  0xf7   : > { %v340_v16 = vadd.f32 %v339_v14, %v251_v13  ;;  %v341_v17 = vpop.f32.mrb[3].mxu0 }
  0xf8   : > { %v342_v18 = vadd.f32 %v341_v17, %v251_v13  ;;  %345 = vadd.xlane.f32.xlu1 %v344_v15 }
  0xfa   : > { %v347_v19 = vadd.f32 %v342_v18, %v340_v16 }
  0xfc   : > { %348 = vadd.xlane.f32.xlu1 %v347_v19 }
 0x185   : > { %v346_v20 = vpop.xlane.xlu1 %345 }
 0x186   : > { %v350_v21 = vmul.f32 0.00390625, %v346_v20 }
 0x188   : > { %v352_v22 = vsub.f32 %v334_v10, %v350_v21  ;;  %v353_v23 = vsub.f32 %v336_v12, %v350_v21 }
 0x189   : > { %v349_v24 = vpop.xlane.xlu1 %348 }
 0x18a   : > { %v351_v25 = vmul.f32 0.00390625, %v349_v24  ;;  %v356_v26 = vmul.f32 %v352_v22, %v352_v22  ;;  %v357_v27 = vmul.f32 %v353_v23, %v353_v23  ;;  %v1110_v24 = vmov 1966171168  }
 0x18c   : > { %v354_v28 = vsub.f32 %v340_v16, %v351_v25  ;;  %v355_v29 = vsub.f32 %v342_v18, %v351_v25  ;;  %v360_v30 = vadd.f32 %v357_v27, %v356_v26  ;;  %v521_v25 = vunpack.c.l.s4 %v1110_v24 }
 0x18d   : > { %v523_v26 = vlaneseq }
 0x18e   : > { %361 = vadd.xlane.f32.xlu0 %v360_v30  ;;  %v358_v31 = vmul.f32 %v354_v28, %v354_v28  ;;  %v359_v32 = vmul.f32 %v355_v29, %v355_v29  ;;  %v522_v27 = vunpack.c.0.s8 %v521_v25 }
 0x190   : > { %v363_v33 = vadd.f32 %v359_v32, %v358_v31 }
 0x192   : > { %364 = vadd.xlane.f32.xlu1 %v363_v33 }
 0x1a3   : > { %386 = vperm.xlu1 %1018, %v382_v34  }
 0x1a7   : > { %391 = vperm.xlu1 %1018, %v383_v35  }
 0x21b   : > { %v362_v36 = vpop.xlane.xlu0 %361 }
 0x21c   : > { %v366_v37 = vmul.f32 0.00390625, %v362_v36 }
 0x21e   : > { %v368_v38 = vadd.f32 1e-05, %v366_v37 }
 0x21f   : > { %v365_v39 = vpop.xlane.xlu1 %364 }
 0x220   : > { %1020 = vrsqrt.f32 %v368_v38  ;;  %v367_v40 = vmul.f32 0.00390625, %v365_v39 }
 0x222   : > { %v369_v41 = vadd.f32 1e-05, %v367_v40 }
 0x223   : > { %v387_v56 = vpop.permute.xlu1 %386 }
 0x224   : > { %1022 = vrsqrt.f32 %v369_v41 }
 0x227   : > { %v392_v61 = vpop.permute.xlu1 %391 }
 0x22a   : > { %v1021_v42 = vpop.eup %1020 }
 0x22b   : > { %v373_v43 = vmul.f32 %v1021_v42, %v353_v23  ;;  %v372_v44 = vmul.f32 %v1021_v42, %v352_v22 }
 0x22d   : > { %v377_v48 = vmax.f32 %v373_v43, 0.0  ;;  %v376_v50 = vmax.f32 %v372_v44, 0.0 }
 0x22e   : > { %v1023_v45 = vpop.eup %1022 }
 0x22f   : > { %v375_v46 = vmul.f32 %v1023_v45, %v355_v29  ;;  %v374_v47 = vmul.f32 %v1023_v45, %v354_v28  ;;  %v524_v28 = vshrl.u32 %v523_v26, 7 }
 0x231   : > { %v379_v49 = vmax.f32 %v375_v46, 0.0  ;;  %v378_v51 = vmax.f32 %v374_v47, 0.0  ;;  %v1232_v32 = vsub.s32 %v522_v27, %v524_v28  ;;  %v1237_v44 = vsub.s32 0, %v524_v28 }
 0x232   : > { %v1239_v45 = vsub.s32 1, %v524_v28 }
 0x233   : > { %v953_v52 = vpack.c.bf16 %v379_v49, %v377_v48  ;;  %v955_v53 = vpack.c.bf16 %v378_v51, %v376_v50 }
 0x235   : > { %954 = vmatprep.subr.bf16.mxu1 %v953_v52 }
 0x236   : > { %956 = vmatpush1.bf16.msra.mxu1 %v955_v53 }
 0x239   : > { %944 = vmatmul.mubr.msk.f32.vlgmr.msra.gmra.mrb[0].mxu1 %vm394_vm2, %v380_v54 }
 0x23a   : > { %471 = vmatprep.mubr.f32.mxu1 %v1108_v0 }
 0x23d   : > { %945 = vmatmul.mubr.msk.f32.gmra.mrb[2].mxu1 %vm394_vm2, %v381_v55 }
 0x30c   : > { %v467_v57 = vpop.f32.mrb[0].mxu1 }
 0x30d   : > { %v468_v58 = vadd.f32 %v467_v57, %v387_v56  ;;  %v469_v59 = vpop.f32.mrb[1].mxu1 }
 0x30e   : > { %v470_v60 = vadd.f32 %v469_v59, %v387_v56 }
 0x310   : > { %v473_v62 = vpop.f32.mrb[2].mxu1  ;;  %v478_v63 = vadd.f32 %v470_v60, %v468_v58 }
 0x311   : > { %v474_v1 = vadd.f32 %v473_v62, %v392_v61  ;;  %v475_v2 = vpop.f32.mrb[3].mxu1 }
 0x312   : > { %v476_v3 = vadd.f32 %v475_v2, %v392_v61  ;;  %479 = vadd.xlane.f32.xlu1 %v478_v63 }
 0x314   : > { %v481_v4 = vadd.f32 %v476_v3, %v474_v1 }
 0x316   : > { %482 = vadd.xlane.f32.xlu0 %v481_v4 }
 0x39f   : > { %v480_v0 = vpop.xlane.xlu1 %479 }
 0x3a0   : > { %v484_v5 = vmul.f32 0.00390625, %v480_v0 }
 0x3a2   : > { %v486_v6 = vsub.f32 %v468_v58, %v484_v5  ;;  %v487_v7 = vsub.f32 %v470_v60, %v484_v5 }
 0x3a3   : > { %v483_v8 = vpop.xlane.xlu0 %482 }
 0x3a4   : > { %v485_v9 = vmul.f32 0.00390625, %v483_v8  ;;  %v490_v10 = vmul.f32 %v486_v6, %v486_v6  ;;  %v491_v11 = vmul.f32 %v487_v7, %v487_v7 }
 0x3a6   : > { %v488_v12 = vsub.f32 %v474_v1, %v485_v9  ;;  %v489_v13 = vsub.f32 %v476_v3, %v485_v9  ;;  %v494_v14 = vadd.f32 %v491_v11, %v490_v10 }
 0x3a8   : > { %495 = vadd.xlane.f32.xlu0 %v494_v14  ;;  %v492_v15 = vmul.f32 %v488_v12, %v488_v12  ;;  %v493_v16 = vmul.f32 %v489_v13, %v489_v13 }
 0x3aa   : > { %v497_v17 = vadd.f32 %v493_v16, %v492_v15 }
 0x3ac   : > { %498 = vadd.xlane.f32.xlu0 %v497_v17 }
 0x435   : > { %v496_v18 = vpop.xlane.xlu0 %495 }
 0x436   : > { %v500_v19 = vmul.f32 0.00390625, %v496_v18 }
 0x438   : > { %v502_v20 = vadd.f32 1e-05, %v500_v19 }
 0x439   : > { %v499_v21 = vpop.xlane.xlu0 %498 }
 0x43a   : > { %1024 = vrsqrt.f32 %v502_v20  ;;  %v501_v22 = vmul.f32 0.00390625, %v499_v21 }
 0x43c   : > { %v503_v23 = vadd.f32 1e-05, %v501_v22 }
 0x43e   : > { %1026 = vrsqrt.f32 %v503_v23 }
 0x444   : > { %v1025_v29 = vpop.eup %1024 }
 0x445   : > { %v506_v30 = vmul.f32 %v1025_v29, %v486_v6  ;;  %v507_v31 = vmul.f32 %v1025_v29, %v487_v7 }
 0x447   : > { %v510_v33 = vmax.f32 %v506_v30, 0.0  ;;  %v511_v34 = vmax.f32 %v507_v31, 0.0 }
 0x448   : > { %v1027_v35 = vpop.eup %1026 }
 0x449   : > { %v518_v36 = vcombine.low %v510_v33, %v511_v34  ;;  %v519_v37 = vcombine.high %v510_v33, %v511_v34  ;;  %v508_v38 = vmul.f32 %v1027_v35, %v488_v12  ;;  %v509_v39 = vmul.f32 %v1027_v35, %v489_v13 }
 0x44b   : > { %v526_v40 = vrot.slane %v518_v36, %v1232_v32  ;;  %v533_v41 = vrot.slane %v519_v37, %v1232_v32  ;;  %v512_v42 = vmax.f32 %v508_v38, 0.0  ;;  %v513_v43 = vmax.f32 %v509_v39, 0.0 }
 0x44d   : > { %v534_v46 = vcombine.high %v526_v40, %v526_v40  ;;  %v535_v47 = vcombine.high %v533_v41, %v533_v41  ;;  %v542_v48 = vrot.slane %v526_v40, %v1232_v32  ;;  %v549_v49 = vrot.slane %v533_v41, %v1232_v32 }
 0x44e   : > { %v568_v50 = vcombine.low %v512_v42, %v513_v43  ;;  %v569_v51 = vcombine.high %v512_v42, %v513_v43 }
 0x44f   : > { %v556_v52 = vrot.slane %v534_v46, %v1232_v32  ;;  %v563_v53 = vrot.slane %v535_v47, %v1232_v32  ;;  %v564_v54 = vcombine.high %v542_v48, %v542_v48  ;;  %v565_v55 = vcombine.high %v549_v49, %v549_v49 }
 0x450   : > { %v621_v56 = vrot.slane %v542_v48, %v1237_v44  ;;  %v625_v57 = vrot.slane %v542_v48, %v1239_v45  ;;  %v653_v58 = vrot.slane %v549_v49, %v1237_v44  ;;  %v657_v59 = vrot.slane %v549_v49, %v1239_v45 }
 0x451   : > { %v566_v60 = vcombine.high %v556_v52, %v556_v52  ;;  %v567_v61 = vcombine.high %v563_v53, %v563_v53  ;;  %v629_v62 = vrot.slane %v556_v52, %v1237_v44  ;;  %v633_v63 = vrot.slane %v556_v52, %v1239_v45 }
 0x452   : > { %v637_v1 = vrot.slane %v564_v54, %v1237_v44  ;;  %v641_v2 = vrot.slane %v564_v54, %v1239_v45  ;;  %v661_v3 = vrot.slane %v563_v53, %v1237_v44  ;;  %v665_v4 = vrot.slane %v563_v53, %v1239_v45  ;;  %778 = vst [vmem:[%s1257_s15] sm:$0xff] %v621_v56 }
 0x453   : > { %779 = vst [vmem:[%s1257_s15 + $0x8] sm:$0xff] %v625_v57  ;;  %780 = vst [vmem:[%s1257_s15 + $0x10] sm:$0xff] %v621_v56  ;;  %v645_v0 = vrot.slane %v566_v60, %v1237_v44  ;;  %v649_v5 = vrot.slane %v566_v60, %v1239_v45  ;;  %v669_v6 = vrot.slane %v565_v55, %v1237_v44 }
 0x454   : > { %781 = vst [vmem:[%s1257_s15 + $0x18] sm:$0xff] %v625_v57  ;;  %794 = vst [vmem:[%s1257_s15 + $0x80] sm:$0xff] %v653_v58  ;;  %v673_v7 = vrot.slane %v565_v55, %v1239_v45  ;;  %v677_v8 = vrot.slane %v567_v61, %v1237_v44  ;;  %v681_v9 = vrot.slane %v567_v61, %v1239_v45 }
 0x455   : > { %795 = vst [vmem:[%s1257_s15 + $0x88] sm:$0xff] %v657_v59  ;;  %796 = vst [vmem:[%s1257_s15 + $0x90] sm:$0xff] %v653_v58  ;;  %v576_v10 = vrot.slane %v568_v50, %v1232_v32  ;;  %v583_v11 = vrot.slane %v569_v51, %v1232_v32 }
 0x456   : > { %797 = vst [vmem:[%s1257_s15 + $0x98] sm:$0xff] %v657_v59  ;;  %782 = vst [vmem:[%s1257_s15 + $0x20] sm:$0xff] %v629_v62 }
 0x457   : > { %783 = vst [vmem:[%s1257_s15 + $0x28] sm:$0xff] %v633_v63  ;;  %784 = vst [vmem:[%s1257_s15 + $0x30] sm:$0xff] %v629_v62  ;;  %v584_v12 = vcombine.high %v576_v10, %v576_v10  ;;  %v585_v13 = vcombine.high %v583_v11, %v583_v11  ;;  %v592_v14 = vrot.slane %v576_v10, %v1232_v32 }
 0x458   : > { %785 = vst [vmem:[%s1257_s15 + $0x38] sm:$0xff] %v633_v63  ;;  %786 = vst [vmem:[%s1257_s15 + $0x40] sm:$0xff] %v637_v1  ;;  %v599_v15 = vrot.slane %v583_v11, %v1232_v32 }
 0x459   : > { %787 = vst [vmem:[%s1257_s15 + $0x48] sm:$0xff] %v641_v2  ;;  %788 = vst [vmem:[%s1257_s15 + $0x50] sm:$0xff] %v637_v1  ;;  %v606_v16 = vrot.slane %v584_v12, %v1232_v32  ;;  %v613_v17 = vrot.slane %v585_v13, %v1232_v32  ;;  %v614_v18 = vcombine.high %v592_v14, %v592_v14 }
 0x45a   : > { %789 = vst [vmem:[%s1257_s15 + $0x58] sm:$0xff] %v641_v2  ;;  %798 = vst [vmem:[%s1257_s15 + $0xa0] sm:$0xff] %v661_v3  ;;  %v615_v19 = vcombine.high %v599_v15, %v599_v15  ;;  %v685_v20 = vrot.slane %v592_v14, %v1237_v44  ;;  %v689_v21 = vrot.slane %v592_v14, %v1239_v45 }
 0x45b   : > { %799 = vst [vmem:[%s1257_s15 + $0xa8] sm:$0xff] %v665_v4  ;;  %800 = vst [vmem:[%s1257_s15 + $0xb0] sm:$0xff] %v661_v3  ;;  %v717_v22 = vrot.slane %v599_v15, %v1237_v44  ;;  %v721_v23 = vrot.slane %v599_v15, %v1239_v45  ;;  %v616_v24 = vcombine.high %v606_v16, %v606_v16 }
 0x45c   : > { %801 = vst [vmem:[%s1257_s15 + $0xb8] sm:$0xff] %v665_v4  ;;  %790 = vst [vmem:[%s1257_s15 + $0x60] sm:$0xff] %v645_v0  ;;  %v617_v25 = vcombine.high %v613_v17, %v613_v17  ;;  %v693_v26 = vrot.slane %v606_v16, %v1237_v44  ;;  %v697_v27 = vrot.slane %v606_v16, %v1239_v45 }
 0x45d   : > { %791 = vst [vmem:[%s1257_s15 + $0x68] sm:$0xff] %v649_v5  ;;  %792 = vst [vmem:[%s1257_s15 + $0x70] sm:$0xff] %v645_v0  ;;  %v701_v28 = vrot.slane %v614_v18, %v1237_v44  ;;  %v705_v29 = vrot.slane %v614_v18, %v1239_v45  ;;  %v725_v30 = vrot.slane %v613_v17, %v1237_v44 }
 0x45e   : > { %793 = vst [vmem:[%s1257_s15 + $0x78] sm:$0xff] %v649_v5  ;;  %802 = vst [vmem:[%s1257_s15 + $0xc0] sm:$0xff] %v669_v6  ;;  %v729_v31 = vrot.slane %v613_v17, %v1239_v45  ;;  %v709_v32 = vrot.slane %v616_v24, %v1237_v44  ;;  %v713_v33 = vrot.slane %v616_v24, %v1239_v45 }
 0x45f   : > { %803 = vst [vmem:[%s1257_s15 + $0xc8] sm:$0xff] %v673_v7  ;;  %804 = vst [vmem:[%s1257_s15 + $0xd0] sm:$0xff] %v669_v6  ;;  %v733_v34 = vrot.slane %v615_v19, %v1237_v44  ;;  %v737_v35 = vrot.slane %v615_v19, %v1239_v45  ;;  %v741_v36 = vrot.slane %v617_v25, %v1237_v44 }
 0x460   : > { %805 = vst [vmem:[%s1257_s15 + $0xd8] sm:$0xff] %v673_v7  ;;  %806 = vst [vmem:[%s1257_s15 + $0xe0] sm:$0xff] %v677_v8  ;;  %v745_v37 = vrot.slane %v617_v25, %v1239_v45 }
 0x461   : > { %807 = vst [vmem:[%s1257_s15 + $0xe8] sm:$0xff] %v681_v9  ;;  %808 = vst [vmem:[%s1257_s15 + $0xf0] sm:$0xff] %v677_v8 }
 0x462   : > { %809 = vst [vmem:[%s1257_s15 + $0xf8] sm:$0xff] %v681_v9  ;;  %810 = vst [vmem:[%s1257_s15 + $0x100] sm:$0xff] %v685_v20 }
 0x463   : > { %811 = vst [vmem:[%s1257_s15 + $0x108] sm:$0xff] %v689_v21  ;;  %812 = vst [vmem:[%s1257_s15 + $0x110] sm:$0xff] %v685_v20 }
 0x464   : > { %813 = vst [vmem:[%s1257_s15 + $0x118] sm:$0xff] %v689_v21  ;;  %826 = vst [vmem:[%s1257_s15 + $0x180] sm:$0xff] %v717_v22 }
 0x465   : > { %827 = vst [vmem:[%s1257_s15 + $0x188] sm:$0xff] %v721_v23  ;;  %828 = vst [vmem:[%s1257_s15 + $0x190] sm:$0xff] %v717_v22 }
 0x466   : > { %829 = vst [vmem:[%s1257_s15 + $0x198] sm:$0xff] %v721_v23  ;;  %814 = vst [vmem:[%s1257_s15 + $0x120] sm:$0xff] %v693_v26 }
 0x467   : > { %815 = vst [vmem:[%s1257_s15 + $0x128] sm:$0xff] %v697_v27  ;;  %816 = vst [vmem:[%s1257_s15 + $0x130] sm:$0xff] %v693_v26 }
 0x468   : > { %817 = vst [vmem:[%s1257_s15 + $0x138] sm:$0xff] %v697_v27  ;;  %818 = vst [vmem:[%s1257_s15 + $0x140] sm:$0xff] %v701_v28 }
 0x469   : > { %819 = vst [vmem:[%s1257_s15 + $0x148] sm:$0xff] %v705_v29  ;;  %820 = vst [vmem:[%s1257_s15 + $0x150] sm:$0xff] %v701_v28 }
 0x46a   : > { %821 = vst [vmem:[%s1257_s15 + $0x158] sm:$0xff] %v705_v29  ;;  %830 = vst [vmem:[%s1257_s15 + $0x1a0] sm:$0xff] %v725_v30 }
 0x46b   : > { %831 = vst [vmem:[%s1257_s15 + $0x1a8] sm:$0xff] %v729_v31  ;;  %832 = vst [vmem:[%s1257_s15 + $0x1b0] sm:$0xff] %v725_v30 }
 0x46c   : > { %833 = vst [vmem:[%s1257_s15 + $0x1b8] sm:$0xff] %v729_v31  ;;  %822 = vst [vmem:[%s1257_s15 + $0x160] sm:$0xff] %v709_v32 }
 0x46d   : > { %823 = vst [vmem:[%s1257_s15 + $0x168] sm:$0xff] %v713_v33  ;;  %824 = vst [vmem:[%s1257_s15 + $0x170] sm:$0xff] %v709_v32 }
 0x46e   : > { %825 = vst [vmem:[%s1257_s15 + $0x178] sm:$0xff] %v713_v33  ;;  %834 = vst [vmem:[%s1257_s15 + $0x1c0] sm:$0xff] %v733_v34 }
 0x46f   : > { %835 = vst [vmem:[%s1257_s15 + $0x1c8] sm:$0xff] %v737_v35  ;;  %836 = vst [vmem:[%s1257_s15 + $0x1d0] sm:$0xff] %v733_v34 }
 0x470   : > { %837 = vst [vmem:[%s1257_s15 + $0x1d8] sm:$0xff] %v737_v35  ;;  %838 = vst [vmem:[%s1257_s15 + $0x1e0] sm:$0xff] %v741_v36 }
 0x471   : > { %839 = vst [vmem:[%s1257_s15 + $0x1e8] sm:$0xff] %v745_v37  ;;  %840 = vst [vmem:[%s1257_s15 + $0x1f0] sm:$0xff] %v741_v36 }
 0x472   : > { %841 = vst [vmem:[%s1257_s15 + $0x1f8] sm:$0xff] %v745_v37 }
 0x473   : > { %1041 = shalt.err (!%p1038_p5)
}
 0x474   : > { %s1042_s10 = scalar_lea.hbm %s1334_s25, 8192  ;;  %s1046_s13 = scalar_lea.hbm %s1413_s5, 16384 }
 0x475   : > { %p1043_p6 = scmp.ne.s32.totalorder %s1334_s25, %s1042_s10  ;;  %p1047_p10 = scmp.lt.u32.totalorder %s1334_s25, %s1413_s5 }
 0x476   : > { %p1048_p11 = scmp.lt.u32.totalorder %s1046_s13, %s1042_s10  ;;  %p1050_p13 = scmp.lt.u32.totalorder %s1042_s10, %s1334_s25 }
 0x477   : > { %p1044_p7 = pnand %p1043_p6, %p1184_p4 }
 0x478   : > { %p1049_p12 = por %p1048_p11, %p1047_p10 }
 0x479   : > { %p1045_p9 = pneg %p1044_p7 }
 0x47a   : > { %p1051_p0 = por %p1050_p13, %p1049_p12 }
 0x47c   : > { %p1052_p1 = pnand %p1051_p0, %p1045_p9 }
 0x47e   : > { %1055 = shalt.err (!%p1052_p1)
}
 0x47f   : > { %s1112_s16 = smov 256   ;;  %s1113_s21 = smov 16  }
 0x480   : > { %957 = dma.vmem_to_hbm [thread:$0]  (%p1184_p4), %s1336_s17, 8192, %s1334_s25, %s1362_s27, %s1112_s16, %s1112_s16, %s1113_s21  }
 0x481 PF: > { %p963_p2 = scmp.ge.s32.totalorder %s1106_s23, 2  ;;  %s874_s24 = sand.u32 1, %s1086_s18  }
 0x482   : > { %s875_s29 = scalar_lea.sflag [#allocation3], %s874_s24 }
 0x483   : > { %p960_p3 = pnand %p963_p2, %p1191_p8 }
 0x485   : > { %1081 = dma.done.wait (!%p960_p3), %s875_s29, 8192  }
 0x486   : > { %1083 = vsyncadd (!%p960_p3), %s875_s29, 4294959104  ;;  %s18_s23 = sadd.s32 1, %s1106_s23   ;;  %s1416_s18 = smov %s1090_s19 }
 0x487   : > { %p15_p5 = scmp.ge.s32.totalorder %s18_s23, 4   ;;  %s1417_s19 = smov %s1094_s20 }
 0x488   : > { %s1418_s20 = smov %s1197_s6  ;;  %s1419_s21 = smov %s1102_s22 }
 0x489   : > { %s1420_s22 = smov %s1422_s26  ;;  %17 = sbr.rel (!%p15_p5) target bundleno = 4 (0x4), region = 75 }
 0x490   :  { %880 = vsyncpa [#allocation3], 1 }
 0x491   :  { %882 = vsyncpa [#allocation3 + $0x1], 1 }

</bundles_post_ra>
